<compile_context>
chip_gen: v5e
topology: v5e:2x2
jax: 0.10.0
libtpu: 0.0.40
codegen_flags: <defaults>
</compile_context>

<pallas_src>
import functools

import jax
import jax.numpy as jnp
from jax.experimental import pallas as pl
from jax.experimental.pallas import tpu as pltpu

_MIB = 1024 * 1024


def _round_up(x, m):
    return ((x + m - 1) // m) * m


def _drop_path_kernel(x_ref, scale_ref, o_ref):
    # x_ref/o_ref: (TB, TF) tiles in x's dtype; scale_ref: (TB, 1) f32.
    # Cast only the tiny scale column; the (TB,1)->(TB,TF) lane broadcast is a
    # cheap VPU op and the full-tile multiply stays in the native dtype.
    o_ref[...] = x_ref[...] * scale_ref[...].astype(x_ref.dtype)


def _vmem_capacity_bytes():
    try:
        return int(pltpu.get_tpu_info().vmem_capacity_bytes)
    except Exception:
        return 64 * _MIB  # conservative (v7x-sized) fallback


def _choose_tiles(B, F, itemsize, tile_cap_bytes):
    # Sublane packing: 8 rows/vreg for 4-byte dtypes, 16 for 2-byte, 32 for 1-byte.
    sublane = max(8, 32 // max(itemsize, 1))
    F128 = _round_up(F, 128)
    # Row tile: clamp to the (sublane-rounded) batch first — DropPath batches
    # are small, the feature axis carries the tile volume.
    max_rows = max(sublane, ((tile_cap_bytes // (128 * itemsize)) // sublane) * sublane)
    TB = min(_round_up(B, sublane), max_rows)
    # Lane tile: spend the remaining per-tile byte budget on lanes (multiple of
    # 128), capped at the 128-rounded feature extent.  Wide lane-dense output
    # blocks keep stores as unmasked vst.
    TF = max(128, ((tile_cap_bytes // (TB * itemsize)) // 128) * 128)
    TF = min(TF, F128)
    return TB, TF


@functools.partial(jax.jit, static_argnames=("drop_prob", "training"))
def drop_path(x, key, drop_prob: float = 0.0, training: bool = False):
    """JAX/Pallas equivalent of drop_path_f (batch is the leading dim)."""
    if drop_prob == 0.0 or not training:
        return x

    keep_prob = 1.0 - drop_prob
    B = x.shape[0]
    F = 1
    for d in x.shape[1:]:
        F *= d

    # Per-sample binary mask: floor(keep_prob + U[0,1)) == Bernoulli(keep_prob),
    # matching the PyTorch reference.  The tiny (B,) RNG draw stays in JAX glue;
    # the kernel only streams x.
    rand = jax.random.uniform(key, (B,), dtype=jnp.float32)
    mask = jnp.floor(keep_prob + rand)
    scale = (mask / jnp.float32(keep_prob)).reshape(B, 1)  # 0 or 1/keep_prob

    itemsize = jnp.dtype(x.dtype).itemsize
    vmem_cap = _vmem_capacity_bytes()
    # Per-tile cap: ~6 MiB on v7x (64 MiB VMEM), ~8 MiB on v5e/v6e (128 MiB).
    tile_cap = 6 * _MIB if vmem_cap <= 64 * _MIB else 8 * _MIB
    TB, TF = _choose_tiles(B, F, itemsize, tile_cap)

    nb, nf = pl.cdiv(B, TB), pl.cdiv(F, TF)
    # v7x has 2 TensorCores: keep >=2 blocks along a "parallel" axis if possible.
    if nb == 1 and nf == 1 and TF >= 256:
        TF = _round_up(TF // 2, 128)
        nf = pl.cdiv(F, TF)

    tile_bytes = TB * TF * itemsize
    # Double-buffered input + output tiles (+ tiny scale) plus headroom; stays
    # well under physical VMEM on every generation.
    vmem_limit = int(min(max(32 * _MIB, 4 * tile_bytes + 4 * _MIB),
                         vmem_cap - 8 * _MIB))

    x2d = x.reshape(B, F)  # free view; no padding, partial blocks are masked

    out2d = pl.pallas_call(
        _drop_path_kernel,
        out_shape=jax.ShapeDtypeStruct((B, F), x.dtype),
        grid=(nb, nf),  # feature axis innermost -> scale block reused across it
        in_specs=[
            pl.BlockSpec((TB, TF), lambda i, j: (i, j)),
            pl.BlockSpec((TB, 1), lambda i, j: (i, 0)),
        ],
        out_specs=pl.BlockSpec((TB, TF), lambda i, j: (i, j)),
        compiler_params=pltpu.CompilerParams(
            dimension_semantics=("parallel", "parallel"),
            vmem_limit_bytes=vmem_limit),
        cost_estimate=pl.CostEstimate(
            flops=B * F,
            transcendentals=0,
            bytes_accessed=2 * B * F * itemsize + B * 4),
    )(x2d, scale)

    return out2d.reshape(x.shape)


class DropPath:
    """Mirror of the PyTorch DropPath module (no parameters)."""

    def __init__(self, drop_prob=None):
        self.drop_prob = drop_prob if drop_prob is not None else 0.0
        self.training = True

    def __call__(self, x, key):
        return drop_path(x, key, drop_prob=self.drop_prob, training=self.training)


if __name__ == "__main__":
    key = jax.random.PRNGKey(0)
    kx, kmask = jax.random.split(key)

    # NCHW input, small shapes.
    B, C, H, W = 2, 4, 16, 16
    x = jax.random.normal(kx, (B, C, H, W), dtype=jnp.float32)

    module = DropPath(drop_prob=0.2)
    module.training = True
    out = jax.block_until_ready(module(x, kmask))

    # Reference (pure JAX, same RNG draw as the kernel wrapper).
    keep_prob = 1.0 - 0.2
    rand = jax.random.uniform(kmask, (B,), dtype=jnp.float32)
    mask = jnp.floor(keep_prob + rand).reshape(B, 1, 1, 1)
    ref = x / keep_prob * mask
    assert jnp.allclose(out, ref, atol=1e-6), "mismatch vs reference"

    # Ragged shapes (F not a multiple of 128, B not a multiple of 8) exercise the
    # masked partial boundary blocks (no padding in the wrapper).
    B2, C2, H2, W2 = 5, 3, 7, 9
    x2 = jax.random.normal(kx, (B2, C2, H2, W2), dtype=jnp.float32)
    out2 = jax.block_until_ready(drop_path(x2, kmask, drop_prob=0.2, training=True))
    rand2 = jax.random.uniform(kmask, (B2,), dtype=jnp.float32)
    mask2 = jnp.floor(keep_prob + rand2).reshape(B2, 1, 1, 1)
    ref2 = x2 / keep_prob * mask2
    assert jnp.allclose(out2, ref2, atol=1e-6), "mismatch vs reference (ragged)"

    # bf16 path (native-dtype multiply inside the kernel).
    x3 = jax.random.normal(kx, (4, 8, 16, 16), dtype=jnp.bfloat16)
    out3 = jax.block_until_ready(drop_path(x3, kmask, drop_prob=0.2, training=True))
    rand3 = jax.random.uniform(kmask, (4,), dtype=jnp.float32)
    mask3 = jnp.floor(keep_prob + rand3).reshape(4, 1, 1, 1)
    ref3 = (x3.astype(jnp.float32) / keep_prob * mask3).astype(jnp.bfloat16)
    assert jnp.allclose(out3.astype(jnp.float32), ref3.astype(jnp.float32),
                        rtol=2e-2, atol=2e-2), "mismatch vs reference (bf16)"

    # Eval mode / drop_prob=0 returns x unchanged.
    module.training = False
    out_eval = jax.block_until_ready(module(x, kmask))
    assert jnp.array_equal(out_eval, x)

    print("KERNEL_OK")
</pallas_src>

<mosaic_0001>
module attributes {stable_mosaic.version = 11 : i64} {
  func.func @_drop_path_kernel(%arg0: i32, %arg1: i32, %arg2: memref<8x512xf32, #tpu.memory_space<vmem>>, %arg3: memref<8x1xf32, #tpu.memory_space<vmem>>, %arg4: memref<8x512xf32, #tpu.memory_space<vmem>>) attributes {dimension_semantics = [#tpu.dimension_semantics<parallel>, #tpu.dimension_semantics<parallel>], iteration_bounds = array<i64: 1, 2>, scalar_prefetch = 0 : i64, scratch_operands = 0 : i64, tpu.core_type = #tpu.core_type<tc>, window_params = [{transform_indices = @transform_0, window_bounds = array<i64: 8, 512>}, {transform_indices = @transform_1, window_bounds = array<i64: 8, 1>}, {transform_indices = @transform_2, window_bounds = array<i64: 8, 512>}]} {
    %c0 = arith.constant 0 : index
    %c0_0 = arith.constant 0 : index
    %0 = vector.load %arg2[%c0, %c0_0] : memref<8x512xf32, #tpu.memory_space<vmem>>, vector<8x512xf32>
    %c0_1 = arith.constant 0 : index
    %c0_2 = arith.constant 0 : index
    %1 = vector.load %arg3[%c0_1, %c0_2] : memref<8x1xf32, #tpu.memory_space<vmem>>, vector<8x1xf32>
    %2 = vector.broadcast %1 : vector<8x1xf32> to vector<8x512xf32>
    %3 = arith.mulf %0, %2 : vector<8x512xf32>
    %c0_3 = arith.constant 0 : index
    %c0_4 = arith.constant 0 : index
    %4 = vector.load %arg4[%c0_3, %c0_4] : memref<8x512xf32, #tpu.memory_space<vmem>>, vector<8x512xf32>
    tpu.vector_store %arg4[%c0_3, %c0_4], %3 {strides = array<i32>} : memref<8x512xf32, #tpu.memory_space<vmem>>, vector<8x512xf32>,
    return
  }
  func.func @transform_0(%arg0: i32, %arg1: i32) -> (i32, i32) {
    %c0_i32 = arith.constant 0 : i32
    return %arg0, %arg1 : i32, i32
  }
  func.func @transform_1(%arg0: i32, %arg1: i32) -> (i32, i32) {
    %c0_i32 = arith.constant 0 : i32
    %c0_i32_0 = arith.constant 0 : i32
    return %arg0, %c0_i32 : i32, i32
  }
  func.func @transform_2(%arg0: i32, %arg1: i32) -> (i32, i32) {
    %c0_i32 = arith.constant 0 : i32
    return %arg0, %arg1 : i32, i32
  }
}

</mosaic_0001>

<bundles_post_ra>
// kernel: drop_path.1
= control target key start
LH: loop header
LB: loop body
LE: loop exit
PB: predicated region body
PF: predicated region fallthrough
CT: control target
= control target key end

     0   :  { %s711_s9 = smov 0   ;;  %s713_s10 = smov 0   ;;  %s786_s0 = inlined_call_operand.vmem [shape: f32[2,1024], index: 0, kind: input, shape index: {}]   ;;  %s787_s1 = inlined_call_operand.vmem [shape: f32[2,1], index: 1, kind: input, shape index: {}]   ;;  %s788_s2 = inlined_call_operand.vmem [shape: f32[2,1024], index: 2, kind: output, shape index: {}]  }
   0x1   :  { %s715_s11 = smov 0   ;;  %s717_s12 = smov 0  }
   0x2   :  { %s719_s13 = smov 0  }
   0x3 LB: > { %s21_s14 = sadd.s32 1, %s680_s12  ;;  %s482_s15 = sadd.s32 4294967295, %s684_s13   ;;  %s684_s13 = sphi %s719_s13, %s12_s13   ;;  %s680_s12 = sphi %s717_s12, %s793_s12   ;;  %s676_s11 = sphi %s715_s11, %s792_s11   ;;  %s672_s10 = sphi %s713_s10, %s791_s10   ;;  %s668_s9 = sphi %s711_s9, %s790_s9  }
   0x4   : > { %p22_p0 = scmp.ge.s32.totalorder %s21_s14, 2  ;;  %p40_p1 = scmp.ne.s32.totalorder %s672_s10, %s668_s9 }
   0x5   : > { %p41_p2 = scmp.eq.s32.totalorder %s684_s13, 0  ;;  %p98_p4 = scmp.eq.s32.totalorder %s482_s15, 1 }
   0x6   : > { %s795_s14 = smov (%p22_p0, %s21_s14), 0  ;;  %s33_s17 = sadd.s32 1, %s672_s10 }
   0x7   : > { %p42_p3 = por %p41_p2, %p40_p1  ;;  %s29_s16 = ssub.s32 %s680_s12, %s795_s14 }
   0x8   : > { %p31_p5 = scmp.eq.s32.totalorder %s29_s16, 0  ;;  %p746_p6 = por %p98_p4, %p40_p1 }
   0x9   : > { %p486_p7 = scmp.ge.s32.totalorder %s684_s13, 2 }
   0xa   : > { %s751_s19 = scalar_select %p31_p5, %s672_s10, %s33_s17  }
   0xb   : > { %133 = sbr.rel (%p486_p7) target bundleno = 29 (0x1d), region = 20 }
  0x10   : > { %136 = sbr.rel (!%p42_p3) target bundleno = 29 (0x1d), region = 24  ;;  %s138_s20 = sand.u32 (%p42_p3), 1, %s672_s10  }
  0x11   : > { %s502_s21 = sshll.u32 (%p42_p3), %s680_s12, 3  ;;  %s487_s22 = sshll.u32 (%p42_p3), %s138_s20, 5 }
  0x12   : > { %s150_s25 = scalar_lea.vmem (%p42_p3), %s786_s0, %s502_s21   ;;  %s140_s26 = scalar_lea.vmem (%p42_p3), [#allocation2], %s487_s22  }
  0x13   : > { %s686_s27 = smov (%p42_p3), 0  }
  0x15 LB: >> { %v189_v0 = vld [vmem:[%s150_s25] sm:$0xff]  ;;  %s183_s27 = sadd.s32 1, %s688_s27   ;;  %s688_s27 = sphi %s686_s27, %s183_s27  }
  0x16   : >> { %190 = vst [vmem:[%s140_s26] sm:$0xff] %v189_v0  ;;  %p182_p8 = scmp.ge.s32.totalorder %s183_s27, 1 }
  0x18   : > { %185 = sbr.rel (!%p182_p8) target bundleno = 21 (0x15), region = 142 }
  0x1d PF: > { %p492_p9 = scmp.ge.s32.totalorder %s684_s13, 1  ;;  %p202_p10 = scmp.lt.s32.totalorder %s684_s13, 3 }
  0x1f   : > { %p203_p11 = pnand %p492_p9, %p202_p10 }
  0x20   : > { %s209_s30 = sand.u32 (!%p203_p11), 1, %s668_s9  }
  0x21   : > { %206 = sbr.rel (%p203_p11) target bundleno = 168 (0xa8), region = 62  ;;  %s493_s3 = sshll.u32 (!%p203_p11), %s209_s30, 5 }
  0x22   : > { %s211_s4 = scalar_lea.vmem (!%p203_p11), [#allocation2], %s493_s3  ;;  %s235_s5 = scalar_lea.vmem (!%p203_p11), [#allocation3], %s493_s3  }
  0x26   : > { %v260_v1 = vld [vmem:[%s787_s1] sm:$0xff]  ;;  %v694_v2 = vmov 0   ;;  %v695_v3 = vmov 269488144   ;;  %s503_s6 = sshll.u32 (%p746_p6), %s676_s11, 3  ;;  %s690_s15 = smov (%p746_p6), 0  }
  0x27   : > { %613 = vset.pattern.permute.xlu0 %v694_v2  ;;  %v266_v4 = vunpack.c.l.s4 %v695_v3  ;;  %v256_v7 = vld [vmem:[%s211_s4] sm:$0xff]  ;;  %s309_s9 = scalar_lea.vmem (%p746_p6), %s788_s2, %s503_s6  }
  0x28   : > { %263 = vperm.xlu0 %613, %v260_v1  }
  0x29   : > { %v267_v5 = vunpack.c.0.s8 %v266_v4 }
  0x9a   : > { %v264_v6 = vpop.permute.xlu0 %263 }
  0x9b   : > { %v268_v8 = vperm.slane %v264_v6, %v267_v5  ;;  %299 = sbr.rel (!%p746_p6) target bundleno = 168 (0xa8), region = 70 }
  0x9d   : > { %v285_v9 = vmul.f32 %v268_v8, %v256_v7 }
  0x9f   : > { %289 = vst [vmem:[%s235_s5] sm:$0xff] %v285_v9 }
  0xa0 LB: >> { %s342_s15 = sadd.s32 1, %s692_s15   ;;  %s692_s15 = sphi %s690_s15, %s342_s15  }
  0xa1   : >> { %p341_p12 = scmp.ge.s32.totalorder %s342_s15, 1 }
  0xa3   : > { %344 = sbr.rel (!%p341_p12) target bundleno = 160 (0xa0), region = 153 }
  0xa6   : >> { %v348_v10 = vld [vmem:[%s235_s5] sm:$0xff] }
  0xa7   : >> { %349 = vst [vmem:[%s309_s9] sm:$0xff] %v348_v10 }
  0xa8 PF: > { %s12_s13 = sadd.s32 1, %s684_s13   ;;  %s790_s9 = smov %s672_s10 }
  0xa9   : > { %p9_p13 = scmp.ge.s32.totalorder %s12_s13, 4   ;;  %s791_s10 = smov %s751_s19 }
  0xaa   : > { %s792_s11 = smov %s680_s12  ;;  %s793_s12 = smov %s795_s14 }
  0xab   :  { %11 = sbr.rel (!%p9_p13) target bundleno = 3 (0x3), region = 164 }

</bundles_post_ra>
